<compile_context>
chip_gen: v7x
topology: tpu7x:2x2x1
jax: 0.10.0
libtpu: 0.0.40
codegen_flags: <defaults>
</compile_context>

<pallas_src>
import functools

import jax
import jax.numpy as jnp
import numpy as np
from jax.experimental import pallas as pl
from jax.experimental.pallas import tpu as pltpu


LANE = 128  # TPU lane width — hidden/class dims are padded to this.


def _round_up(x, m):
    return (x + m - 1) // m * m


def _choose_tm(B):
    """Batch tile size.

    Small B -> one tile covering the whole batch (no wasted MXU rows / x DMA).
    Large B -> ~4 grid steps (>=2 per TensorCore on v7x), 128..1024 rows each.
    """
    if B <= 8:
        return B
    if B <= 128:
        return _round_up(B, 8)
    return int(min(1024, max(128, _round_up(pl.cdiv(B, 4), 128))))


def _mlp_kernel(x_ref, w1_ref, b1_ref, w2_ref, b2_ref, w3_ref, b3_ref, o_ref):
    """Fused 3-layer MLP on one (TM, in_feats) batch tile.

    x arrives as f32 and is cast to bf16 in-VMEM (VPU cast hidden under DMA).
    Weights are bf16; MXU accumulation is f32; biases are f32; output is bf16.
    """
    x = x_ref[...].astype(jnp.bfloat16)

    h1 = jnp.dot(x, w1_ref[...], preferred_element_type=jnp.float32) + b1_ref[...]
    h1 = jnp.maximum(h1, 0.0).astype(jnp.bfloat16)

    h2 = jnp.dot(h1, w2_ref[...], preferred_element_type=jnp.float32) + b2_ref[...]
    h2 = jnp.maximum(h2, 0.0).astype(jnp.bfloat16)

    out = jnp.dot(h2, w3_ref[...], preferred_element_type=jnp.float32) + b3_ref[...]
    o_ref[...] = out.astype(o_ref.dtype)


@functools.partial(jax.jit, static_argnames=("num_classes",))
def mlp_clf_forward(x_nchw, params, *, num_classes):
    """MLPCLF forward.

    x_nchw : (B, C, H, W) float32 (row-major flatten, same as torch.flatten)
    params : prepared dict (see prepare_params): bf16 weights (in, out), f32
             biases (1, out), hidden/class dims zero-padded to multiples of 128.
    Returns (B, num_classes) float32 logits (computed in bf16/f32-accum).
    """
    B = x_nchw.shape[0]
    x_flat = x_nchw.reshape(B, -1)  # free reshape; NO dtype cast / pad here
    in_feats = x_flat.shape[1]
    c0 = params["w1"].shape[1]
    c1 = params["w2"].shape[1]
    ncp = params["w3"].shape[1]  # padded (lane-dense) class dimension

    TM = _choose_tm(B)
    grid = (pl.cdiv(B, TM),)  # Pallas masks the partial edge block

    weight_bytes = sum(int(p.size) * p.dtype.itemsize for p in params.values())
    flops = 2 * B * (in_feats * c0 + c0 * c1 + c1 * ncp)
    bytes_accessed = B * in_feats * 4 + weight_bytes + B * ncp * 2

    # Rough VMEM residency: double-buffered f32 x tile + bf16 out tile, plus
    # weights (counted twice to be safe) and slack.
    vmem_est = 2 * TM * in_feats * 4 + 2 * TM * ncp * 2 + 2 * weight_bytes + (2 << 20)
    cp_kwargs = dict(dimension_semantics=("parallel",))
    if vmem_est > 30 * 1024 * 1024:
        # TODO(synk): for very large in_feats (e.g. 3x224x224) switch to a K-tiled
        # first layer with an f32 accumulator instead of just raising the limit.
        cp_kwargs["vmem_limit_bytes"] = int(min(vmem_est, 64 * 1024 * 1024))

    out_padded = pl.pallas_call(
        _mlp_kernel,
        out_shape=jax.ShapeDtypeStruct((B, ncp), jnp.bfloat16),
        grid=grid,
        in_specs=[
            # x: one f32 batch tile per grid step (double-buffered by Pallas).
            pl.BlockSpec((TM, in_feats), lambda i: (i, 0)),
            # Weights/biases: full-array blocks, constant index_map -> loaded
            # once and kept VMEM-resident across all batch tiles.
            pl.BlockSpec((in_feats, c0), lambda i: (0, 0)),
            pl.BlockSpec((1, c0), lambda i: (0, 0)),
            pl.BlockSpec((c0, c1), lambda i: (0, 0)),
            pl.BlockSpec((1, c1), lambda i: (0, 0)),
            pl.BlockSpec((c1, ncp), lambda i: (0, 0)),
            pl.BlockSpec((1, ncp), lambda i: (0, 0)),
        ],
        out_specs=pl.BlockSpec((TM, ncp), lambda i: (i, 0)),
        compiler_params=pltpu.CompilerParams(**cp_kwargs),
        cost_estimate=pl.CostEstimate(
            flops=int(flops), transcendentals=0, bytes_accessed=int(bytes_accessed)
        ),
    )(
        x_flat,
        params["w1"], params["b1"],
        params["w2"], params["b2"],
        params["w3"], params["b3"],
    )

    # Drop padded class columns; cast the tiny logits slice back to f32.
    return out_padded[:, :num_classes].astype(jnp.float32)


def init_params(key, input_size, channels, num_classes):
    """torch.nn.Linear-style init (U[-k, k], k = 1/sqrt(fan_in)).

    Weights are returned transposed to (in_features, out_features); biases (1, out).
    """
    in_feats = (input_size, *channels)
    out_feats = (*channels, num_classes)
    params = {}
    for i, (fin, fout) in enumerate(zip(in_feats, out_feats), start=1):
        key, kw, kb = jax.random.split(key, 3)
        bound = 1.0 / np.sqrt(fin)
        params[f"w{i}"] = jax.random.uniform(kw, (fin, fout), jnp.float32, -bound, bound)
        params[f"b{i}"] = jax.random.uniform(kb, (1, fout), jnp.float32, -bound, bound)
    return params


def prepare_params(params):
    """Device-ready params: bf16 weights, f32 biases, all output dims padded to 128.

    Zero padding is inert: padded hidden units get zero weight + zero bias, so
    ReLU keeps them at 0 and the padded rows of the next weight contribute nothing.
    """
    c0 = params["w1"].shape[1]
    c1 = params["w2"].shape[1]
    nc = params["w3"].shape[1]
    c0p = _round_up(c0, LANE)
    c1p = _round_up(c1, LANE)
    ncp = _round_up(nc, LANE)

    w1 = jnp.pad(params["w1"], ((0, 0), (0, c0p - c0)))
    b1 = jnp.pad(params["b1"], ((0, 0), (0, c0p - c0)))
    w2 = jnp.pad(params["w2"], ((0, c0p - c0), (0, c1p - c1)))
    b2 = jnp.pad(params["b2"], ((0, 0), (0, c1p - c1)))
    w3 = jnp.pad(params["w3"], ((0, c1p - c1), (0, ncp - nc)))
    b3 = jnp.pad(params["b3"], ((0, 0), (0, ncp - nc)))

    return {
        "w1": w1.astype(jnp.bfloat16), "b1": b1.astype(jnp.float32),
        "w2": w2.astype(jnp.bfloat16), "b2": b2.astype(jnp.float32),
        "w3": w3.astype(jnp.bfloat16), "b3": b3.astype(jnp.float32),
    }


if __name__ == "__main__":
    # Small shapes consistent with the module's forward:
    # batch=2, image_size=(3, 16, 16) -> input_size=768, channels=(128, 64), 10 classes.
    B = 2
    image_size = (3, 16, 16)
    channels = (128, 64)
    num_classes = 10
    input_size = int(np.prod(image_size))

    key = jax.random.PRNGKey(0)
    key, kx = jax.random.split(key)
    x = jax.random.normal(kx, (B, *image_size), dtype=jnp.float32)

    params_f32 = init_params(key, input_size, channels, num_classes)
    params = prepare_params(params_f32)

    out = mlp_clf_forward(x, params, num_classes=num_classes)
    out = jax.block_until_ready(out)

    # Pure-JAX reference with identical dtype handling (bf16 matmul inputs,
    # f32 accumulation, bf16 logits writeback).
    xf = x.reshape(B, -1).astype(jnp.bfloat16)
    h1 = jnp.maximum(
        jnp.dot(xf, params["w1"], preferred_element_type=jnp.float32) + params["b1"], 0.0
    ).astype(jnp.bfloat16)
    h2 = jnp.maximum(
        jnp.dot(h1, params["w2"], preferred_element_type=jnp.float32) + params["b2"], 0.0
    ).astype(jnp.bfloat16)
    ref = (
        jnp.dot(h2, params["w3"], preferred_element_type=jnp.float32) + params["b3"]
    ).astype(jnp.bfloat16)[:, :num_classes].astype(jnp.float32)

    np.testing.assert_allclose(np.asarray(out), np.asarray(ref), rtol=2e-2, atol=2e-2)
    assert out.shape == (B, num_classes) and out.dtype == jnp.float32
    print("KERNEL_OK")
</pallas_src>

<mosaic_0001>
module attributes {stable_mosaic.version = 11 : i64} {
  func.func @_mlp_kernel(%arg0: i32, %arg1: memref<2x768xf32, #tpu.memory_space<vmem>>, %arg2: memref<768x128xbf16, #tpu.memory_space<vmem>>, %arg3: memref<1x128xf32, #tpu.memory_space<vmem>>, %arg4: memref<128x128xbf16, #tpu.memory_space<vmem>>, %arg5: memref<1x128xf32, #tpu.memory_space<vmem>>, %arg6: memref<128x128xbf16, #tpu.memory_space<vmem>>, %arg7: memref<1x128xf32, #tpu.memory_space<vmem>>, %arg8: memref<2x128xbf16, #tpu.memory_space<vmem>>) attributes {dimension_semantics = [#tpu.dimension_semantics<parallel>], iteration_bounds = array<i64: 1>, scalar_prefetch = 0 : i64, scratch_operands = 0 : i64, tpu.core_type = #tpu.core_type<tc>, window_params = [{transform_indices = @transform_0, window_bounds = array<i64: 2, 768>}, {pipeline_mode = #tpu.pipeline_mode<synchronous>, transform_indices = @transform_1, window_bounds = array<i64: 768, 128>}, {pipeline_mode = #tpu.pipeline_mode<synchronous>, transform_indices = @transform_2, window_bounds = array<i64: 1, 128>}, {pipeline_mode = #tpu.pipeline_mode<synchronous>, transform_indices = @transform_3, window_bounds = array<i64: 128, 128>}, {pipeline_mode = #tpu.pipeline_mode<synchronous>, transform_indices = @transform_4, window_bounds = array<i64: 1, 128>}, {pipeline_mode = #tpu.pipeline_mode<synchronous>, transform_indices = @transform_5, window_bounds = array<i64: 128, 128>}, {pipeline_mode = #tpu.pipeline_mode<synchronous>, transform_indices = @transform_6, window_bounds = array<i64: 1, 128>}, {transform_indices = @transform_7, window_bounds = array<i64: 2, 128>}]} {
    %c0 = arith.constant 0 : index
    %c0_0 = arith.constant 0 : index
    %0 = vector.load %arg1[%c0, %c0_0] : memref<2x768xf32, #tpu.memory_space<vmem>>, vector<2x768xf32>
    %1 = arith.truncf %0 : vector<2x768xf32> to vector<2x768xbf16>
    %c0_1 = arith.constant 0 : index
    %c0_2 = arith.constant 0 : index
    %2 = vector.load %arg2[%c0_1, %c0_2] : memref<768x128xbf16, #tpu.memory_space<vmem>>, vector<768x128xbf16>
    %cst = arith.constant dense<0.000000e+00> : vector<2x128xf32>
    %3 = tpu.matmul %1, %2, %cst {dimension_numbers = #tpu.dot_dimension_numbers<[1], [0], [0], [1], [0, 0, 1, 1], [], []>} : vector<2x768xbf16>, vector<768x128xbf16>, vector<2x128xf32> -> vector<2x128xf32>
    %c0_3 = arith.constant 0 : index
    %c0_4 = arith.constant 0 : index
    %4 = vector.load %arg3[%c0_3, %c0_4] : memref<1x128xf32, #tpu.memory_space<vmem>>, vector<1x128xf32>
    %5 = vector.broadcast %4 : vector<1x128xf32> to vector<2x128xf32>
    %6 = arith.addf %3, %5 : vector<2x128xf32>
    %cst_5 = arith.constant 0.000000e+00 : f32
    %7 = vector.broadcast %cst_5 : f32 to vector<2x128xf32>
    %8 = arith.maximumf %6, %7 : vector<2x128xf32>
    %9 = arith.truncf %8 : vector<2x128xf32> to vector<2x128xbf16>
    %c0_6 = arith.constant 0 : index
    %c0_7 = arith.constant 0 : index
    %10 = vector.load %arg4[%c0_6, %c0_7] : memref<128x128xbf16, #tpu.memory_space<vmem>>, vector<128x128xbf16>
    %cst_8 = arith.constant dense<0.000000e+00> : vector<2x128xf32>
    %11 = tpu.matmul %9, %10, %cst_8 {dimension_numbers = #tpu.dot_dimension_numbers<[1], [0], [0], [1], [0, 0, 1, 1], [], []>} : vector<2x128xbf16>, vector<128x128xbf16>, vector<2x128xf32> -> vector<2x128xf32>
    %c0_9 = arith.constant 0 : index
    %c0_10 = arith.constant 0 : index
    %12 = vector.load %arg5[%c0_9, %c0_10] : memref<1x128xf32, #tpu.memory_space<vmem>>, vector<1x128xf32>
    %13 = vector.broadcast %12 : vector<1x128xf32> to vector<2x128xf32>
    %14 = arith.addf %11, %13 : vector<2x128xf32>
    %cst_11 = arith.constant 0.000000e+00 : f32
    %15 = vector.broadcast %cst_11 : f32 to vector<2x128xf32>
    %16 = arith.maximumf %14, %15 : vector<2x128xf32>
    %17 = arith.truncf %16 : vector<2x128xf32> to vector<2x128xbf16>
    %c0_12 = arith.constant 0 : index
    %c0_13 = arith.constant 0 : index
    %18 = vector.load %arg6[%c0_12, %c0_13] : memref<128x128xbf16, #tpu.memory_space<vmem>>, vector<128x128xbf16>
    %cst_14 = arith.constant dense<0.000000e+00> : vector<2x128xf32>
    %19 = tpu.matmul %17, %18, %cst_14 {dimension_numbers = #tpu.dot_dimension_numbers<[1], [0], [0], [1], [0, 0, 1, 1], [], []>} : vector<2x128xbf16>, vector<128x128xbf16>, vector<2x128xf32> -> vector<2x128xf32>
    %c0_15 = arith.constant 0 : index
    %c0_16 = arith.constant 0 : index
    %20 = vector.load %arg7[%c0_15, %c0_16] : memref<1x128xf32, #tpu.memory_space<vmem>>, vector<1x128xf32>
    %21 = vector.broadcast %20 : vector<1x128xf32> to vector<2x128xf32>
    %22 = arith.addf %19, %21 : vector<2x128xf32>
    %23 = arith.truncf %22 : vector<2x128xf32> to vector<2x128xbf16>
    %c0_17 = arith.constant 0 : index
    %c0_18 = arith.constant 0 : index
    %24 = vector.load %arg8[%c0_17, %c0_18] : memref<2x128xbf16, #tpu.memory_space<vmem>>, vector<2x128xbf16>
    tpu.vector_store %arg8[%c0_17, %c0_18], %23 {strides = array<i32>} : memref<2x128xbf16, #tpu.memory_space<vmem>>, vector<2x128xbf16>,
    return
  }
  func.func @transform_0(%arg0: i32) -> (i32, i32) {
    %c0_i32 = arith.constant 0 : i32
    %c0_i32_0 = arith.constant 0 : i32
    return %arg0, %c0_i32 : i32, i32
  }
  func.func @transform_1(%arg0: i32) -> (i32, i32) {
    %c0_i32 = arith.constant 0 : i32
    %c0_i32_0 = arith.constant 0 : i32
    %c0_i32_1 = arith.constant 0 : i32
    return %c0_i32, %c0_i32_0 : i32, i32
  }
  func.func @transform_2(%arg0: i32) -> (i32, i32) {
    %c0_i32 = arith.constant 0 : i32
    %c0_i32_0 = arith.constant 0 : i32
    %c0_i32_1 = arith.constant 0 : i32
    return %c0_i32, %c0_i32_0 : i32, i32
  }
  func.func @transform_3(%arg0: i32) -> (i32, i32) {
    %c0_i32 = arith.constant 0 : i32
    %c0_i32_0 = arith.constant 0 : i32
    %c0_i32_1 = arith.constant 0 : i32
    return %c0_i32, %c0_i32_0 : i32, i32
  }
  func.func @transform_4(%arg0: i32) -> (i32, i32) {
    %c0_i32 = arith.constant 0 : i32
    %c0_i32_0 = arith.constant 0 : i32
    %c0_i32_1 = arith.constant 0 : i32
    return %c0_i32, %c0_i32_0 : i32, i32
  }
  func.func @transform_5(%arg0: i32) -> (i32, i32) {
    %c0_i32 = arith.constant 0 : i32
    %c0_i32_0 = arith.constant 0 : i32
    %c0_i32_1 = arith.constant 0 : i32
    return %c0_i32, %c0_i32_0 : i32, i32
  }
  func.func @transform_6(%arg0: i32) -> (i32, i32) {
    %c0_i32 = arith.constant 0 : i32
    %c0_i32_0 = arith.constant 0 : i32
    %c0_i32_1 = arith.constant 0 : i32
    return %c0_i32, %c0_i32_0 : i32, i32
  }
  func.func @transform_7(%arg0: i32) -> (i32, i32) {
    %c0_i32 = arith.constant 0 : i32
    %c0_i32_0 = arith.constant 0 : i32
    return %arg0, %c0_i32 : i32, i32
  }
}

</mosaic_0001>

<bundles_post_ra>
// kernel: mlp_clf_forward.1
= control target key start
LH: loop header
LB: loop body
LE: loop exit
PB: predicated region body
PF: predicated region fallthrough
CT: control target
= control target key end

     0   :  { %12 = vsyncpa [#allocation3], 0  ;;  %s1303_s0 = inlined_call_operand.vmem [shape: f32[2,768], index: 0, kind: input, shape index: {}]   ;;  %s1304_s1 = inlined_call_operand.hbm [shape: bf16[768,128], index: 1, kind: input, shape index: {}]   ;;  %s1305_s2 = inlined_call_operand.vmem [shape: f32[1,128], index: 2, kind: input, shape index: {}]   ;;  %s1306_s3 = inlined_call_operand.vmem [shape: bf16[128,128], index: 3, kind: input, shape index: {}]   ;;  %s1307_s4 = inlined_call_operand.vmem [shape: f32[1,128], index: 4, kind: input, shape index: {}]   ;;  %s1308_s5 = inlined_call_operand.vmem [shape: bf16[128,128], index: 5, kind: input, shape index: {}]   ;;  %s1309_s6 = inlined_call_operand.hbm [shape: f32[1,128], index: 6, kind: input, shape index: {}]   ;;  %s1310_s7 = inlined_call_operand.vmem [shape: bf16[2,128], index: 7, kind: output, shape index: {}]  }
   0x1   :  { %13 = vsyncpa [#allocation5], 0  ;;  %s1151_s24 = smov [#allocation2]   ;;  %s1103_s28 = scalar_lea.hbm %s1304_s1, 6144 }
   0x2   :  { %s21_s25 = sshll.u32 %s1151_s24, 4  ;;  %p1104_p0 = scmp.ne.s32.totalorder %s1304_s1, %s1103_s28  ;;  %s22_s25 = int_to_ptr.vmem [resolvable:$true] %s21_s25 }
   0x3   :  { %p1107_p1 = scmp.lt.u32.totalorder %s1103_s28, %s1304_s1 }
   0x5   :  { %p1109_p2 = pnand %p1107_p1, %p1104_p0 }
   0x7   :  { %1112 = shalt.err (!%p1109_p2)
}
   0x8   :  { %s1113_s10 = scalar_lea.vmem %s22_s25, 6144  ;;  %p1118_p4 = scmp.lt.s32.totalorder %s22_s25, %s22_s25 }
   0x9   :  { %p1114_p3 = scmp.ne.s32.totalorder %s22_s25, %s1113_s10  ;;  %p1119_p5 = scmp.lt.s32.totalorder %s1113_s10, %s1113_s10 }
   0xb   :  { %p1120_p6 = por %p1119_p5, %p1118_p4 }
   0xd   :  { %p1121_p7 = pnand %p1120_p6, %p1114_p3 }
   0xf   :  { %1124 = shalt.err (!%p1121_p7)
}
  0x10   :  { %s1152_s11 = smov 64   ;;  %s1153_s12 = smov 4  }
  0x11   :  { %27 = dma.hbm_to_vmem [thread:$0]  %s1304_s1, 6144, %s22_s25, [#allocation3], %s1152_s11, %s1152_s11, %s1153_s12  }
  0x12   :  { %s1154_s15 = smov [#allocation4]   ;;  %s1125_s19 = scalar_lea.hbm %s1309_s6, 16 }
  0x13   :  { %s42_s16 = sshll.u32 %s1154_s15, 4  ;;  %p1126_p8 = scmp.ne.s32.totalorder %s1309_s6, %s1125_s19  ;;  %s43_s16 = int_to_ptr.vmem [resolvable:$true] %s42_s16 }
  0x14   :  { %p1129_p9 = scmp.lt.u32.totalorder %s1125_s19, %s1309_s6 }
  0x16   :  { %p1131_p10 = pnand %p1129_p9, %p1126_p8 }
  0x18   :  { %1134 = shalt.err (!%p1131_p10)
}
  0x19   :  { %s1135_s24 = scalar_lea.vmem %s43_s16, 16  ;;  %s1139_s1 = scalar_lea.vmem %s43_s16, 32 }
  0x1a   :  { %p1136_p11 = scmp.ne.s32.totalorder %s43_s16, %s1135_s24  ;;  %p1140_p12 = scmp.lt.s32.totalorder %s43_s16, %s43_s16 }
  0x1b   :  { %p1141_p13 = scmp.lt.s32.totalorder %s1139_s1, %s1135_s24 }
  0x1d   :  { %p1142_p0 = por %p1141_p13, %p1140_p12 }
  0x1f   :  { %p1143_p1 = pnand %p1142_p0, %p1136_p11 }
  0x21   :  { %1146 = shalt.err (!%p1143_p1)
}
  0x22   :  { %45 = dma.hbm_to_vmem [thread:$0]  %s1309_s6, 16, %s43_s16, [#allocation5]  }
  0x23   :  { %1147 = dma.done.wait [#allocation3], 6144  }
  0x24   :  { %1148 = vsyncadd [#allocation3], 4294961152 }
  0x25   :  { %1149 = dma.done.wait [#allocation5], 16  }
  0x26   :  { %1150 = vsyncadd [#allocation5], 4294967280  ;;  %v1038_v0 = vld [vmem:[#allocation2 + $0x40] sm:$0xff]   ;;  %v1042_v4 = vld [vmem:[#allocation2 + $0x48] sm:$0xff]   ;;  %v1155_v21 = vmov 1983009808   ;;  %v61_v23 = vlaneseq }
  0x27   :  { %v1039_v1 = vld [vmem:[#allocation2] sm:$0xff]   ;;  %907 = vmatprep.subr.bf16.mxu0 %v1038_v0  ;;  %v1043_v5 = vld [vmem:[#allocation2 + $0x8] sm:$0xff]   ;;  %v1046_v8 = vld [vmem:[#allocation2 + $0x50] sm:$0xff]   ;;  %v59_v22 = vunpack.c.l.s4 %v1155_v21  ;;  %vm1157_vm0 = vmmov 0  }
  0x28   :  { %v1040_v2 = vld [vmem:[#allocation2 + $0xc0] sm:$0xff]   ;;  %908 = vmatpush3.bf16.msra.mxu0 %v1039_v1  ;;  %v1044_v6 = vld [vmem:[#allocation2 + $0xc8] sm:$0xff]   ;;  %v1047_v9 = vld [vmem:[#allocation2 + $0x10] sm:$0xff]   ;;  %v62_v29 = vshrl.u32 %v61_v23, 7 }
  0x29   :  { %v1041_v3 = vld [vmem:[#allocation2 + $0x80] sm:$0xff]   ;;  %929 = vmatprep.subr.bf16.mxu1 %v1040_v2  ;;  %909 = vmatprep.subr.bf16.mxu0 %v1042_v4  ;;  %v1045_v7 = vld [vmem:[#allocation2 + $0x88] sm:$0xff]   ;;  %v1048_v10 = vld [vmem:[#allocation2 + $0xd0] sm:$0xff]   ;;  %v60_v28 = vunpack.c.0.s8 %v59_v22 }
  0x2a   :  { %930 = vmatpush3.bf16.msra.mxu1 %v1041_v3  ;;  %v1049_v11 = vld [vmem:[#allocation2 + $0x90] sm:$0xff]   ;;  %v1050_v12 = vld [vmem:[#allocation2 + $0x58] sm:$0xff]   ;;  %v1054_v16 = vld [vmem:[#allocation2 + $0x60] sm:$0xff]  }
  0x2b   :  { %931 = vmatprep.subr.bf16.mxu1 %v1044_v6  ;;  %v1051_v13 = vld [vmem:[#allocation2 + $0x18] sm:$0xff]   ;;  %v1055_v17 = vld [vmem:[#allocation2 + $0x20] sm:$0xff]   ;;  %v1058_v20 = vld [vmem:[#allocation2 + $0x68] sm:$0xff]   ;;  %v63_v34 = vsub.s32 %v60_v28, %v62_v29 }
  0x2c   :  { %910 = vmatpush3.bf16.msra.mxu0 %v1043_v5  ;;  %v1052_v14 = vld [vmem:[#allocation2 + $0xd8] sm:$0xff]   ;;  %v1056_v18 = vld [vmem:[#allocation2 + $0xe0] sm:$0xff]   ;;  %v1059_v24 = vld [vmem:[#allocation2 + $0x28] sm:$0xff]   ;;  %v1156_v5 = vmov 0.0  }
  0x2d   :  { %911 = vmatprep.subr.bf16.mxu0 %v1046_v8  ;;  %v1053_v15 = vld [vmem:[#allocation2 + $0x98] sm:$0xff]   ;;  %v1057_v19 = vld [vmem:[#allocation2 + $0xa0] sm:$0xff]   ;;  %v1060_v25 = vld [vmem:[#allocation2 + $0xe8] sm:$0xff]  }
  0x2e   :  { %932 = vmatpush3.bf16.msra.mxu1 %v1045_v7  ;;  %v1061_v26 = vld [vmem:[#allocation2 + $0xa8] sm:$0xff]   ;;  %v1062_v27 = vld [vmem:[#allocation2 + $0x70] sm:$0xff]   ;;  %v1066_v33 = vld [vmem:[#allocation2 + $0x78] sm:$0xff]  }
  0x2f   :  { %933 = vmatprep.subr.bf16.mxu1 %v1048_v10  ;;  %v1063_v30 = vld [vmem:[#allocation2 + $0x30] sm:$0xff]   ;;  %v1067_v35 = vld [vmem:[#allocation2 + $0x38] sm:$0xff]   ;;  %v53_v37 = vld [vmem:[%s1303_s0] sm:$0xff] }
  0x30   :  { %912 = vmatpush3.bf16.msra.mxu0 %v1047_v9  ;;  %v1064_v31 = vld [vmem:[#allocation2 + $0xf0] sm:$0xff]   ;;  %v1068_v36 = vld [vmem:[#allocation2 + $0xf8] sm:$0xff]   ;;  %v64_v38 = vrot.slane %v53_v37, %v63_v34  ;;  %v57_v40 = vcombine.high %v53_v37, %v53_v37  ;;  %v1070_v41 = vld [vmem:[#allocation2 + $0x140] sm:$0xff]  }
  0x31   :  { %913 = vmatprep.subr.bf16.mxu0 %v1050_v12  ;;  %v1065_v32 = vld [vmem:[#allocation2 + $0xb0] sm:$0xff]   ;;  %v1069_v39 = vld [vmem:[#allocation2 + $0xb8] sm:$0xff]   ;;  %v1072_v47 = vld [vmem:[#allocation2 + $0x100] sm:$0xff]  }
  0x32   :  { %934 = vmatpush3.bf16.msra.mxu1 %v1049_v11  ;;  %v72_v42 = vcombine.high %v64_v38, %v64_v38  ;;  %v71_v43 = vrot.slane %v57_v40, %v63_v34  ;;  %v88_v44 = vpack.c.bf16 %v64_v38, %v64_v38  ;;  %v1073_v49 = vld [vmem:[#allocation2 + $0x148] sm:$0xff]   ;;  %v1075_v52 = vld [vmem:[#allocation2 + $0x150] sm:$0xff]   ;;  %v1077_v54 = vld [vmem:[#allocation2 + $0x158] sm:$0xff]  }
  0x33   :  { %935 = vmatprep.subr.bf16.mxu1 %v1052_v14  ;;  %v1074_v51 = vld [vmem:[#allocation2 + $0x108] sm:$0xff]   ;;  %v1076_v53 = vld [vmem:[#allocation2 + $0x110] sm:$0xff]   ;;  %v1078_v55 = vld [vmem:[#allocation2 + $0x118] sm:$0xff]  }
  0x34   :  { %914 = vmatpush3.bf16.msra.mxu0 %v1051_v13  ;;  %v89_v45 = vpack.c.bf16 %v72_v42, %v72_v42  ;;  %v73_v46 = vcombine.high %v71_v43, %v71_v43  ;;  %v90_v48 = vpack.c.bf16 %v71_v43, %v71_v43  ;;  %v1079_v56 = vld [vmem:[#allocation2 + $0x160] sm:$0xff]   ;;  %v839_v57 = vld.sshfl [vmem:[%s1303_s0 + $0x8] sm:$0x33 pattern:$0x76325410]  ;;  %v1083_v63 = vld [vmem:[#allocation2 + $0x170] sm:$0xff]  }
  0x35   :  { %915 = vmatprep.subr.bf16.mxu0 %v1054_v16  ;;  %v81_v58 = vcombine.high %v839_v57, %v839_v57  ;;  %v1080_v59 = vld [vmem:[#allocation2 + $0x120] sm:$0xff]   ;;  %v1081_v60 = vld [vmem:[#allocation2 + $0x168] sm:$0xff]   ;;  %v1084_v0 = vld [vmem:[#allocation2 + $0x130] sm:$0xff]   ;;  %v92_v3 = vpack.c.bf16 %v839_v57, %v839_v57 }
  0x36   :  { %936 = vmatpush3.bf16.msra.mxu1 %v1053_v15  ;;  %517 = vmatprep.mubr.bf16.mxu0 %v89_v45  ;;  %v91_v50 = vpack.c.bf16 %v73_v46, %v73_v46  ;;  %v1082_v62 = vld [vmem:[#allocation2 + $0x128] sm:$0xff]   ;;  %v1085_v1 = vld [vmem:[#allocation2 + $0x178] sm:$0xff]   ;;  %v1087_v4 = vld [vmem:[%s1306_s3] sm:$0xff]  }
  0x37   :  { %937 = vmatprep.subr.bf16.mxu1 %v1056_v18  ;;  %v93_v61 = vpack.c.bf16 %v81_v58, %v81_v58  ;;  %v1086_v2 = vld [vmem:[#allocation2 + $0x138] sm:$0xff]   ;;  %v1088_v6 = vld [vmem:[%s1306_s3 + $0x8] sm:$0xff]   ;;  %v1089_v7 = vld [vmem:[%s1306_s3 + $0x10] sm:$0xff]  }
  0x38   :  { %916 = vmatpush3.bf16.msra.mxu0 %v1055_v17  ;;  %557 = vmatprep.mubr.bf16.mxu1 %v91_v50  ;;  %v1090_v8 = vld [vmem:[%s1306_s3 + $0x18] sm:$0xff]   ;;  %v1091_v9 = vld [vmem:[%s1306_s3 + $0x20] sm:$0xff]   ;;  %v1092_v10 = vld [vmem:[%s1306_s3 + $0x28] sm:$0xff]  }
  0x39   :  { %917 = vmatprep.subr.bf16.mxu0 %v1058_v20  ;;  %v1093_v11 = vld [vmem:[%s1306_s3 + $0x30] sm:$0xff]   ;;  %v1094_v12 = vld [vmem:[%s1306_s3 + $0x38] sm:$0xff]   ;;  %v1095_v13 = vld [vmem:[%s1308_s5] sm:$0xff]  }
  0x3a   :  { %938 = vmatpush3.bf16.msra.mxu1 %v1057_v19  ;;  %v1096_v14 = vld [vmem:[%s1308_s5 + $0x8] sm:$0xff]   ;;  %v1097_v15 = vld [vmem:[%s1308_s5 + $0x10] sm:$0xff]   ;;  %v1098_v16 = vld [vmem:[%s1308_s5 + $0x18] sm:$0xff]  }
  0x3b   :  { %939 = vmatprep.subr.bf16.mxu1 %v1060_v25  ;;  %v1099_v17 = vld [vmem:[%s1308_s5 + $0x20] sm:$0xff]   ;;  %v1100_v18 = vld [vmem:[%s1308_s5 + $0x28] sm:$0xff]   ;;  %v1101_v40 = vld [vmem:[%s1308_s5 + $0x30] sm:$0xff]  }
  0x3c   :  { %918 = vmatpush3.bf16.msra.mxu0 %v1059_v24  ;;  %v840_v20 = vld [vmem:[%s1305_s2] ss:$0 sm:$0xff] }
  0x3d   :  { %919 = vmatprep.subr.bf16.mxu0 %v1062_v27  ;;  %v889_v42 = vld [vmem:[%s1307_s4] ss:$0 sm:$0xff] }
  0x3e   :  { %940 = vmatpush3.bf16.msra.mxu1 %v1061_v26  ;;  %v898_v50 = vld [vmem:[#allocation4] ss:$0 sm:$0xff] }
  0x3f   :  { %941 = vmatprep.subr.bf16.mxu1 %v1064_v31 }
  0x40   :  { %920 = vmatpush3.bf16.msra.mxu0 %v1063_v30 }
  0x41   :  { %921 = vmatprep.subr.bf16.mxu0 %v1066_v33 }
  0x42   :  { %942 = vmatpush3.bf16.msra.mxu1 %v1065_v32 }
  0x43   :  { %943 = vmatprep.subr.bf16.mxu1 %v1068_v36 }
  0x44   :  { %922 = vmatpush3.bf16.msra.mxu0 %v1067_v35 }
  0x45   :  { %951 = vmatprep.subr.bf16.mxu0 %v1070_v41  ;;  %v1102_v41 = vld [vmem:[%s1308_s5 + $0x38] sm:$0xff]  }
  0x46   :  { %944 = vmatpush3.bf16.msra.mxu1 %v1069_v39 }
  0x47   :  { %518 = vmatmul.mubr.bf16.vlgmr.msra.gmra.mrb[0].mxu0 %v88_v44  ;;  %991 = vmatprep.subr.bf16.mxu1 %v1156_v5 }
  0x48   :  { %952 = vmatpush3.bf16.msra.mxu0 %v1072_v47  ;;  %597 = vmatprep.mubr.bf16.mxu0 %v93_v61 }
  0x49   :  { %558 = vmatmul.mubr.bf16.vlgmr.msra.gmra.mrb[0].mxu1 %v90_v48  ;;  %953 = vmatprep.subr.bf16.mxu0 %v1073_v49 }
  0x4a   :  { %992 = vmatpush3.bf16.msra.mxu1 %v1087_v4  ;;  %1007 = vmatprep.mubr.msk.bf16.mxu1 %vm1157_vm0, %v1156_v5 }
  0x4b   :  { %993 = vmatprep.subr.bf16.mxu1 %v1156_v5 }
  0x4c   :  { %954 = vmatpush3.bf16.msra.mxu0 %v1074_v51 }
  0x4d   :  { %955 = vmatprep.subr.bf16.mxu0 %v1075_v52 }
  0x4e   :  { %994 = vmatpush3.bf16.msra.mxu1 %v1088_v6 }
  0x4f   :  { %995 = vmatprep.subr.bf16.mxu1 %v1156_v5 }
  0x50   :  { %956 = vmatpush3.bf16.msra.mxu0 %v1076_v53 }
  0x51   :  { %957 = vmatprep.subr.bf16.mxu0 %v1077_v54 }
  0x52   :  { %996 = vmatpush3.bf16.msra.mxu1 %v1089_v7 }
  0x53   :  { %997 = vmatprep.subr.bf16.mxu1 %v1156_v5 }
  0x54   :  { %958 = vmatpush3.bf16.msra.mxu0 %v1078_v55 }
  0x55   :  { %959 = vmatprep.subr.bf16.mxu0 %v1079_v56 }
  0x56   :  { %998 = vmatpush3.bf16.msra.mxu1 %v1090_v8 }
  0x57   :  { %999 = vmatprep.subr.bf16.mxu1 %v1156_v5 }
  0x58   :  { %960 = vmatpush3.bf16.msra.mxu0 %v1080_v59 }
  0x59   :  { %961 = vmatprep.subr.bf16.mxu0 %v1081_v60 }
  0x5a   :  { %1000 = vmatpush3.bf16.msra.mxu1 %v1091_v9 }
  0x5b   :  { %1001 = vmatprep.subr.bf16.mxu1 %v1156_v5 }
  0x5c   :  { %962 = vmatpush3.bf16.msra.mxu0 %v1082_v62 }
  0x5d   :  { %963 = vmatprep.subr.bf16.mxu0 %v1083_v63 }
  0x5e   :  { %1002 = vmatpush3.bf16.msra.mxu1 %v1092_v10 }
  0x5f   :  { %1003 = vmatprep.subr.bf16.mxu1 %v1156_v5 }
  0x60   :  { %964 = vmatpush3.bf16.msra.mxu0 %v1084_v0 }
  0x61   :  { %965 = vmatprep.subr.bf16.mxu0 %v1085_v1 }
  0x62   :  { %1004 = vmatpush3.bf16.msra.mxu1 %v1093_v11 }
  0x63   :  { %1005 = vmatprep.subr.bf16.mxu1 %v1156_v5 }
  0x64   :  { %966 = vmatpush3.bf16.msra.mxu0 %v1086_v2 }
  0x65   :  { %1011 = vmatprep.subr.bf16.mxu0 %v1156_v5 }
  0x66   :  { %1006 = vmatpush3.bf16.msra.mxu1 %v1094_v12 }
  0x67   :  { %598 = vmatmul.mubr.bf16.vlgmr.msra.gmra.mrb[4].mxu0 %v92_v3 }
  0x68   :  { %1027 = vmatprep.mubr.msk.bf16.mxu0 %vm1157_vm0, %v1156_v5  ;;  %1012 = vmatpush3.bf16.msra.mxu0 %v1095_v13 }
  0x69   :  { %1013 = vmatprep.subr.bf16.mxu0 %v1156_v5 }
  0x6c   :  { %1014 = vmatpush3.bf16.msra.mxu0 %v1096_v14 }
  0x6d   :  { %1015 = vmatprep.subr.bf16.mxu0 %v1156_v5 }
  0x70   :  { %1016 = vmatpush3.bf16.msra.mxu0 %v1097_v15 }
  0x71   :  { %1017 = vmatprep.subr.bf16.mxu0 %v1156_v5 }
  0x74   :  { %1018 = vmatpush3.bf16.msra.mxu0 %v1098_v16 }
  0x75   :  { %1019 = vmatprep.subr.bf16.mxu0 %v1156_v5 }
  0x78   :  { %1020 = vmatpush3.bf16.msra.mxu0 %v1099_v17 }
  0x79   :  { %1021 = vmatprep.subr.bf16.mxu0 %v1156_v5 }
  0x7c   :  { %1022 = vmatpush3.bf16.msra.mxu0 %v1100_v18 }
  0x7d   :  { %1023 = vmatprep.subr.bf16.mxu0 %v1156_v5 }
  0x80   :  { %1024 = vmatpush3.bf16.msra.mxu0 %v1101_v40 }
  0x81   :  { %1025 = vmatprep.subr.bf16.mxu0 %v1156_v5 }
  0x84   :  { %1026 = vmatpush3.bf16.msra.mxu0 %v1102_v41 }
 0x11a   :  { %v923_v19 = vpop.f32.mrb[0].mxu0 }
 0x11b   :  { %v924_v21 = vpop.f32.mrb[1].mxu0 }
 0x11c   :  { %v925_v22 = vadd.f32 %v924_v21, %v923_v19  ;;  %v926_v23 = vpop.f32.mrb[2].mxu0  ;;  %v945_v24 = vpop.f32.mrb[0].mxu1 }
 0x11d   :  { %v927_v25 = vpop.f32.mrb[3].mxu0  ;;  %v946_v26 = vpop.f32.mrb[1].mxu1 }
 0x11e   :  { %v520_v27 = vadd.f32 %v925_v22, %v840_v20  ;;  %v947_v28 = vadd.f32 %v946_v26, %v945_v24  ;;  %v948_v29 = vpop.f32.mrb[2].mxu1 }
 0x11f   :  { %v949_v30 = vpop.f32.mrb[3].mxu1 }
 0x120   :  { %v560_v31 = vadd.f32 %v947_v28, %v520_v27 }
 0x13a   :  { %v967_v32 = vpop.f32.mrb[4].mxu0 }
 0x13b   :  { %v968_v33 = vpop.f32.mrb[5].mxu0 }
 0x13c   :  { %v969_v34 = vadd.f32 %v968_v33, %v967_v32  ;;  %v970_v35 = vpop.f32.mrb[6].mxu0 }
 0x13d   :  { %v971_v36 = vpop.f32.mrb[7].mxu0 }
 0x13e   :  { %v600_v37 = vadd.f32 %v969_v34, %v560_v31 }
 0x140   :  { %v605_v38 = vmax.f32 %v600_v37, 0.0 }
 0x142   :  { %v606_v39 = vpack.c.bf16 %v605_v38, %v605_v38 }
 0x144   :  { %1008 = vmatmul.mubr.bf16.vlgmr.msra.gmra.mrb[4].mxu1 %v606_v39 }
 0x217   :  { %v712_v43 = vpop.f32.mrb[4].mxu1 }
 0x218   :  { %v713_v44 = vadd.f32 %v889_v42, %v712_v43  ;;  %v1009_v45 = vpop.f32.mrb[5].mxu1 }
 0x219   :  { %v715_v46 = vpop.f32.mrb[6].mxu1 }
 0x21a   :  { %v718_v47 = vmax.f32 %v713_v44, 0.0  ;;  %v1010_v48 = vpop.f32.mrb[7].mxu1 }
 0x21c   :  { %v719_v49 = vpack.c.bf16 %v718_v47, %v718_v47 }
 0x21e   :  { %1028 = vmatmul.mubr.bf16.vlgmr.msra.gmra.mrb[8].mxu0 %v719_v49 }
 0x2f1   :  { %v825_v51 = vpop.f32.mrb[8].mxu0 }
 0x2f2   :  { %v826_v52 = vadd.f32 %v898_v50, %v825_v51  ;;  %v1029_v53 = vpop.f32.mrb[9].mxu0 }
 0x2f3   :  { %v828_v54 = vpop.f32.mrb[10].mxu0 }
 0x2f4   :  { %v831_v55 = vpack.c.bf16 %v826_v52, %v826_v52  ;;  %v1030_v56 = vpop.f32.mrb[11].mxu0 }
 0x2f6   :  { %832 = vst [vmem:[%s1310_s7] sm:$0x1] %v831_v55 }
 0x2f7   :  { %837 = vsyncpa [#allocation3], 1 }
 0x2f8   :  { %838 = vsyncpa [#allocation5], 1 }

</bundles_post_ra>
